<compile_context>
chip_gen: v7x
topology: tpu7x:2x2x1
jax: 0.10.0
libtpu: 0.0.40
codegen_flags: <defaults>
</compile_context>

<pallas_src>
import functools

import jax
import jax.numpy as jnp
from jax import lax
from jax.experimental import pallas as pl
from jax.experimental.pallas import tpu as pltpu


def _round_up(n: int, m: int) -> int:
    return ((n + m - 1) // m) * m


def _pad2(a, mp, np_):
    m, n = a.shape
    if (m, n) == (mp, np_):
        return a
    return jnp.zeros((mp, np_), a.dtype).at[:m, :n].set(a)


# ----------------------------------------------------------------------------
# Generic tiled matmul kernel (used for the hoisted input / output projections).
# ----------------------------------------------------------------------------
def _matmul_kernel(a_ref, b_ref, o_ref, acc_ref):
    @pl.when(pl.program_id(2) == 0)
    def _():
        acc_ref[...] = jnp.zeros_like(acc_ref)

    acc_ref[...] += jnp.dot(a_ref[...], b_ref[...],
                            preferred_element_type=jnp.float32)
    o_ref[...] = acc_ref[...].astype(o_ref.dtype)


def pallas_matmul(a, b, out_dtype=jnp.float32, tm=128, tn=128, tk=512):
    """C = A @ B with f32 accumulation.  Zero-pads to tile multiples (exact)."""
    m, k = a.shape
    k2, n = b.shape
    assert k == k2
    tm = min(tm, _round_up(m, 8))
    tn = min(tn, _round_up(n, 128))
    tk = min(tk, _round_up(k, 128))
    mp, kp, np_ = _round_up(m, tm), _round_up(k, tk), _round_up(n, tn)
    a_p = _pad2(a, mp, kp)
    b_p = _pad2(b, kp, np_)

    out = pl.pallas_call(
        _matmul_kernel,
        out_shape=jax.ShapeDtypeStruct((mp, np_), out_dtype),
        grid_spec=pltpu.PrefetchScalarGridSpec(
            num_scalar_prefetch=0,
            grid=(mp // tm, np_ // tn, kp // tk),
            in_specs=[pl.BlockSpec((tm, tk), lambda i, j, kk: (i, kk)),
                      pl.BlockSpec((tk, tn), lambda i, j, kk: (kk, j))],
            out_specs=pl.BlockSpec((tm, tn), lambda i, j, kk: (i, j)),
            scratch_shapes=[pltpu.VMEM((tm, tn), jnp.float32)]),
        compiler_params=pltpu.CompilerParams(
            dimension_semantics=("parallel", "parallel", "arbitrary")),
    )(a_p, b_p)
    return out[:m, :n]


# ----------------------------------------------------------------------------
# Recurrent kernel: h_t = tanh(pre_x_t + h_{t-1} @ W_h2h + b_h), TT steps per grid step.
# ----------------------------------------------------------------------------
def _rnn_recurrence_kernel(px_ref, h0_ref, whh_ref, bh_ref, hs_ref, h_scr, *, tt_chunk):
    step = pl.program_id(0)

    @pl.when(step == 0)
    def _init():
        h_scr[...] = h0_ref[...]

    cdt = whh_ref.dtype              # MXU compute dtype (bf16 or f32)
    whh = whh_ref[...]               # resident weight, loaded once per grid step
    bh = bh_ref[...]                 # (1, Hp) f32

    def body(tt, carry):
        h_prev = h_scr[...]                                    # (Bp, Hp) f32
        pre = px_ref[tt] + jnp.dot(h_prev.astype(cdt), whh,
                                   preferred_element_type=jnp.float32) + bh
        h_new = jnp.tanh(pre)                                  # f32 epilogue (EUP)
        h_scr[...] = h_new
        hs_ref[tt] = h_new.astype(hs_ref.dtype)                # bf16 writeback on perf path
        return carry

    lax.fori_loop(0, tt_chunk, body, 0, unroll=True)


@functools.partial(jax.jit, static_argnames=("compute_dtype", "tt_chunk"))
def rnn_forward_sequence(x_seq, h0, params, compute_dtype=jnp.bfloat16, tt_chunk=8):
    """Run the RNN cell over a whole sequence.

    x_seq : (T, B, input_size)      h0 : (B, hidden_size)
    params: w_i2h (I,H), w_h2h (H,H), b_h2h (1,H), w_h2o (H,O), b_h2o (1,O)
            (weights pre-transposed to (in, out); PyTorch nn.Linear stores (out, in))
    Returns: out_seq (T, B, output_size), h_last (B, hidden_size)
    """
    T, B, I = x_seq.shape
    H = params["w_h2h"].shape[0]
    O = params["w_h2o"].shape[1]
    cdt = jnp.dtype(compute_dtype)

    # --- 1) Hoisted input projection: one big matmul over all T*B rows. -------------
    x_flat = x_seq.reshape(T * B, I).astype(cdt)
    pre_x = pallas_matmul(x_flat, params["w_i2h"].astype(cdt),
                          out_dtype=jnp.float32).reshape(T, B, H)

    # --- 2) Recurrence (the only sequential part). -----------------------------------
    Hp = _round_up(H, 128)
    Bp = _round_up(B, 16)
    TT = min(tt_chunk, T)
    Tp = _round_up(T, TT)

    px_p = jnp.zeros((Tp, Bp, Hp), jnp.float32).at[:T, :B, :H].set(pre_x)
    h0_p = jnp.zeros((Bp, Hp), jnp.float32).at[:B, :H].set(h0.astype(jnp.float32))
    whh_p = jnp.zeros((Hp, Hp), cdt).at[:H, :H].set(params["w_h2h"].astype(cdt))
    bh_p = jnp.zeros((1, Hp), jnp.float32).at[:, :H].set(
        params["b_h2h"].astype(jnp.float32))

    hs_dtype = cdt                           # bf16 hidden-sequence writeback on perf path
    hs_isz = jnp.dtype(hs_dtype).itemsize

    # Real VMEM footprint (resident refs single-buffered, streamed refs double-buffered).
    footprint = (Hp * Hp * cdt.itemsize            # W_h2h (Buffered(1))
                 + Bp * Hp * 4 + Hp * 4            # h0, b_h (Buffered(1))
                 + Bp * Hp * 4                     # scratch h
                 + 2 * TT * Bp * Hp * 4            # pre_x chunks (double-buffered)
                 + 2 * TT * Bp * Hp * hs_isz)      # hidden-sequence chunks
    vmem_limit = int(min(64 * 2**20, max(16 * 2**20, 2 * footprint)))

    flops = Tp * 2 * Bp * Hp * Hp
    transcendentals = Tp * Bp * Hp
    bytes_accessed = (Tp * Bp * Hp * 4 + Hp * Hp * cdt.itemsize + Bp * Hp * 4
                      + Hp * 4 + Tp * Bp * Hp * hs_isz)

    hs_p = pl.pallas_call(
        functools.partial(_rnn_recurrence_kernel, tt_chunk=TT),
        out_shape=jax.ShapeDtypeStruct((Tp, Bp, Hp), hs_dtype),
        grid_spec=pltpu.PrefetchScalarGridSpec(
            num_scalar_prefetch=0,
            grid=(Tp // TT,),
            in_specs=[
                # streamed pre_x chunk (TT timesteps per grid step)
                pl.BlockSpec((TT, Bp, Hp), lambda s: (s, 0, 0)),
                # resident, constant-index operands -> single-buffered
                pl.BlockSpec((Bp, Hp), lambda s: (0, 0),
                             pipeline_mode=pl.Buffered(1)),       # h0
                pl.BlockSpec((Hp, Hp), lambda s: (0, 0),
                             pipeline_mode=pl.Buffered(1)),       # W_h2h
                pl.BlockSpec((1, Hp), lambda s: (0, 0),
                             pipeline_mode=pl.Buffered(1)),       # b_h2h
            ],
            out_specs=pl.BlockSpec((TT, Bp, Hp), lambda s: (s, 0, 0)),  # hidden sequence
            scratch_shapes=[pltpu.VMEM((Bp, Hp), jnp.float32)],         # carried hidden
        ),
        compiler_params=pltpu.CompilerParams(
            dimension_semantics=("arbitrary",),        # time is sequential
            vmem_limit_bytes=vmem_limit),
        cost_estimate=pl.CostEstimate(
            flops=flops, transcendentals=transcendentals,
            bytes_accessed=bytes_accessed),
    )(px_p, h0_p, whh_p, bh_p)

    # --- 3) Hoisted output projection: one big matmul over all T*B rows. -------------
    hs = hs_p[:T, :B, :H]
    out_flat = pallas_matmul(hs.reshape(T * B, H).astype(cdt),
                             params["w_h2o"].astype(cdt), out_dtype=jnp.float32)
    out = (out_flat + params["b_h2o"].astype(jnp.float32)).reshape(T, B, O)

    h_last = hs_p[T - 1, :B, :H]
    return out.astype(x_seq.dtype), h_last.astype(h0.dtype)


def rnn_forward_step(x, hidden_state, params, compute_dtype=jnp.bfloat16):
    """Single-step API matching the nn.Module forward(x, hidden_state) -> (out, h_new)."""
    out_seq, h_new = rnn_forward_sequence(x[None], hidden_state, params,
                                          compute_dtype=compute_dtype)
    return out_seq[0], h_new


def init_params(key, input_size, hidden_size, output_size, dtype=jnp.float32):
    """Deterministic init mirroring nn.Linear's U(-1/sqrt(fan_in), 1/sqrt(fan_in)),
    with weights stored pre-transposed as (in, out)."""
    k1, k2, k3, k4, k5 = jax.random.split(key, 5)

    def u(k, shape, fan_in):
        bound = 1.0 / jnp.sqrt(fan_in)
        return jax.random.uniform(k, shape, dtype, minval=-bound, maxval=bound)

    return {
        "w_i2h": u(k1, (input_size, hidden_size), input_size),
        "w_h2h": u(k2, (hidden_size, hidden_size), hidden_size),
        "b_h2h": u(k3, (1, hidden_size), hidden_size),
        "w_h2o": u(k4, (hidden_size, output_size), hidden_size),
        "b_h2o": u(k5, (1, output_size), hidden_size),
    }


def reference_forward_sequence(x_seq, h0, params):
    """Pure-JAX f32 reference: the PyTorch forward applied per timestep."""
    hp = jax.lax.Precision.HIGHEST

    def step(h, x):
        h_new = jnp.tanh(jnp.dot(x, params["w_i2h"], precision=hp)
                         + jnp.dot(h, params["w_h2h"], precision=hp)
                         + params["b_h2h"])
        out = jnp.dot(h_new, params["w_h2o"], precision=hp) + params["b_h2o"]
        return h_new, out

    h_last, outs = jax.lax.scan(step, h0, x_seq)
    return outs, h_last


if __name__ == "__main__":
    seq_len = 8
    batch_size = 2
    input_size = 16
    hidden_size = 32
    output_size = 8

    key = jax.random.PRNGKey(0)
    kx, kp = jax.random.split(key)

    x_seq = jax.random.normal(kx, (seq_len, batch_size, input_size), jnp.float32)
    hidden0 = jnp.zeros((batch_size, hidden_size), jnp.float32)   # init_zero_hidden
    params = init_params(kp, input_size, hidden_size, output_size)

    out_ref, h_ref = reference_forward_sequence(x_seq, hidden0, params)

    # Exact-semantics path: f32 MXU inputs, f32 hidden-sequence writeback.
    out_f32, h_f32 = rnn_forward_sequence(x_seq, hidden0, params,
                                          compute_dtype=jnp.float32)
    jax.block_until_ready((out_f32, h_f32))
    assert jnp.allclose(out_f32, out_ref, atol=2e-3), "f32 output mismatch"
    assert jnp.allclose(h_f32, h_ref, atol=2e-3), "f32 hidden-state mismatch"

    # Performance path: bf16 MXU inputs, f32 accumulation + f32 tanh / hidden carry.
    out_bf16, h_bf16 = rnn_forward_sequence(x_seq, hidden0, params,
                                            compute_dtype=jnp.bfloat16)
    jax.block_until_ready((out_bf16, h_bf16))
    assert jnp.allclose(out_bf16, out_ref, atol=5e-2), "bf16 output mismatch"
    assert jnp.allclose(h_bf16, h_ref, atol=5e-2), "bf16 hidden-state mismatch"

    # Single-step API parity with the nn.Module forward(x, hidden_state).
    out1, h1 = rnn_forward_step(x_seq[0], hidden0, params, compute_dtype=jnp.float32)
    h1_ref = jnp.tanh(x_seq[0] @ params["w_i2h"] + hidden0 @ params["w_h2h"]
                      + params["b_h2h"])
    out1_ref = h1_ref @ params["w_h2o"] + params["b_h2o"]
    jax.block_until_ready((out1, h1))
    assert jnp.allclose(out1, out1_ref, atol=2e-3), "single-step output mismatch"
    assert jnp.allclose(h1, h1_ref, atol=2e-3), "single-step hidden mismatch"

    print("KERNEL_OK")
</pallas_src>

<mosaic_0001>
module attributes {stable_mosaic.version = 11 : i64} {
  func.func @_matmul_kernel(%arg0: i32, %arg1: i32, %arg2: i32, %arg3: memref<16x128xf32, #tpu.memory_space<vmem>>, %arg4: memref<128x128xf32, #tpu.memory_space<vmem>>, %arg5: memref<16x128xf32, #tpu.memory_space<vmem>>, %arg6: memref<16x128xf32, #tpu.memory_space<vmem>>) attributes {dimension_semantics = [#tpu.dimension_semantics<parallel>, #tpu.dimension_semantics<parallel>, #tpu.dimension_semantics<arbitrary>], iteration_bounds = array<i64: 1, 1, 1>, scalar_prefetch = 0 : i64, scratch_operands = 1 : i64, tpu.core_type = #tpu.core_type<tc>, window_params = [{transform_indices = @transform_0, window_bounds = array<i64: 16, 128>}, {transform_indices = @transform_1, window_bounds = array<i64: 128, 128>}, {transform_indices = @transform_2, window_bounds = array<i64: 16, 128>}]} {
    %c0_i32 = arith.constant 0 : i32
    %0 = arith.cmpi eq, %arg2, %c0_i32 : i32
    %1 = arith.extui %0 : i1 to i32
    %c0_i32_0 = arith.constant 0 : i32
    %2 = arith.cmpi ne, %1, %c0_i32_0 : i32
    scf.if %2 {
      %cst_12 = arith.constant 0.000000e+00 : f32
      %11 = vector.broadcast %cst_12 : f32 to vector<16x128xf32>
      %c0_13 = arith.constant 0 : index
      %c0_14 = arith.constant 0 : index
      %12 = vector.load %arg6[%c0_13, %c0_14] : memref<16x128xf32, #tpu.memory_space<vmem>>, vector<16x128xf32>
      tpu.vector_store %arg6[%c0_13, %c0_14], %11 {strides = array<i32>} : memref<16x128xf32, #tpu.memory_space<vmem>>, vector<16x128xf32>,
    } else {
    }
    %c0 = arith.constant 0 : index
    %c0_1 = arith.constant 0 : index
    %3 = vector.load %arg6[%c0, %c0_1] : memref<16x128xf32, #tpu.memory_space<vmem>>, vector<16x128xf32>
    %c0_2 = arith.constant 0 : index
    %c0_3 = arith.constant 0 : index
    %4 = vector.load %arg3[%c0_2, %c0_3] : memref<16x128xf32, #tpu.memory_space<vmem>>, vector<16x128xf32>
    %c0_4 = arith.constant 0 : index
    %c0_5 = arith.constant 0 : index
    %5 = vector.load %arg4[%c0_4, %c0_5] : memref<128x128xf32, #tpu.memory_space<vmem>>, vector<128x128xf32>
    %cst = arith.constant dense<0.000000e+00> : vector<16x128xf32>
    %6 = tpu.matmul %4, %5, %cst {dimension_numbers = #tpu.dot_dimension_numbers<[1], [0], [0], [1], [0, 0, 1, 1], [], []>} : vector<16x128xf32>, vector<128x128xf32>, vector<16x128xf32> -> vector<16x128xf32>
    %7 = arith.addf %3, %6 : vector<16x128xf32>
    %c0_6 = arith.constant 0 : index
    %c0_7 = arith.constant 0 : index
    %8 = vector.load %arg6[%c0_6, %c0_7] : memref<16x128xf32, #tpu.memory_space<vmem>>, vector<16x128xf32>
    tpu.vector_store %arg6[%c0_6, %c0_7], %7 {strides = array<i32>} : memref<16x128xf32, #tpu.memory_space<vmem>>, vector<16x128xf32>,
    %c0_8 = arith.constant 0 : index
    %c0_9 = arith.constant 0 : index
    %9 = vector.load %arg6[%c0_8, %c0_9] : memref<16x128xf32, #tpu.memory_space<vmem>>, vector<16x128xf32>
    %c0_10 = arith.constant 0 : index
    %c0_11 = arith.constant 0 : index
    %10 = vector.load %arg5[%c0_10, %c0_11] : memref<16x128xf32, #tpu.memory_space<vmem>>, vector<16x128xf32>
    tpu.vector_store %arg5[%c0_10, %c0_11], %9 {strides = array<i32>} : memref<16x128xf32, #tpu.memory_space<vmem>>, vector<16x128xf32>,
    return
  }
  func.func @transform_0(%arg0: i32, %arg1: i32, %arg2: i32) -> (i32, i32) {
    %c0_i32 = arith.constant 0 : i32
    return %arg0, %arg2 : i32, i32
  }
  func.func @transform_1(%arg0: i32, %arg1: i32, %arg2: i32) -> (i32, i32) {
    %c0_i32 = arith.constant 0 : i32
    return %arg2, %arg1 : i32, i32
  }
  func.func @transform_2(%arg0: i32, %arg1: i32, %arg2: i32) -> (i32, i32) {
    %c0_i32 = arith.constant 0 : i32
    return %arg0, %arg1 : i32, i32
  }
}

module attributes {stable_mosaic.version = 11 : i64} {
  func.func @_rnn_recurrence_kernel(%arg0: i32, %arg1: memref<8x16x128xf32, #tpu.memory_space<vmem>>, %arg2: memref<16x128xf32, #tpu.memory_space<vmem>>, %arg3: memref<128x128xf32, #tpu.memory_space<vmem>>, %arg4: memref<1x128xf32, #tpu.memory_space<vmem>>, %arg5: memref<8x16x128xf32, #tpu.memory_space<vmem>>, %arg6: memref<16x128xf32, #tpu.memory_space<vmem>>) attributes {dimension_semantics = [#tpu.dimension_semantics<arbitrary>], iteration_bounds = array<i64: 1>, scalar_prefetch = 0 : i64, scratch_operands = 1 : i64, tpu.core_type = #tpu.core_type<tc>, window_params = [{transform_indices = @transform_0, window_bounds = array<i64: 8, 16, 128>}, {pipeline_mode = #tpu.pipeline_mode<synchronous>, transform_indices = @transform_1, window_bounds = array<i64: 16, 128>}, {pipeline_mode = #tpu.pipeline_mode<synchronous>, transform_indices = @transform_2, window_bounds = array<i64: 128, 128>}, {pipeline_mode = #tpu.pipeline_mode<synchronous>, transform_indices = @transform_3, window_bounds = array<i64: 1, 128>}, {transform_indices = @transform_4, window_bounds = array<i64: 8, 16, 128>}]} {
    %c0_i32 = arith.constant 0 : i32
    %0 = arith.cmpi eq, %arg0, %c0_i32 : i32
    %1 = arith.extui %0 : i1 to i32
    %c0_i32_0 = arith.constant 0 : i32
    %2 = arith.cmpi ne, %1, %c0_i32_0 : i32
    scf.if %2 {
      %c0_76 = arith.constant 0 : index
      %c0_77 = arith.constant 0 : index
      %117 = vector.load %arg2[%c0_76, %c0_77] : memref<16x128xf32, #tpu.memory_space<vmem>>, vector<16x128xf32>
      %c0_78 = arith.constant 0 : index
      %c0_79 = arith.constant 0 : index
      %118 = vector.load %arg6[%c0_78, %c0_79] : memref<16x128xf32, #tpu.memory_space<vmem>>, vector<16x128xf32>
      tpu.vector_store %arg6[%c0_78, %c0_79], %117 {strides = array<i32>} : memref<16x128xf32, #tpu.memory_space<vmem>>, vector<16x128xf32>,
    } else {
    }
    %c0 = arith.constant 0 : index
    %c0_1 = arith.constant 0 : index
    %3 = vector.load %arg3[%c0, %c0_1] : memref<128x128xf32, #tpu.memory_space<vmem>>, vector<128x128xf32>
    %c0_2 = arith.constant 0 : index
    %c0_3 = arith.constant 0 : index
    %4 = vector.load %arg4[%c0_2, %c0_3] : memref<1x128xf32, #tpu.memory_space<vmem>>, vector<1x128xf32>
    %c0_i32_4 = arith.constant 0 : i32
    %c0_5 = arith.constant 0 : index
    %c0_6 = arith.constant 0 : index
    %5 = vector.load %arg6[%c0_5, %c0_6] : memref<16x128xf32, #tpu.memory_space<vmem>>, vector<16x128xf32>
    %6 = arith.index_cast %c0_i32_4 : i32 to index
    %c0_7 = arith.constant 0 : index
    %c0_8 = arith.constant 0 : index
    %7 = vector.load %arg1[%6, %c0_7, %c0_8] : memref<8x16x128xf32, #tpu.memory_space<vmem>>, vector<1x16x128xf32>
    %8 = vector.shape_cast %7 : vector<1x16x128xf32> to vector<16x128xf32>
    %cst = arith.constant dense<0.000000e+00> : vector<16x128xf32>
    %9 = tpu.matmul %5, %3, %cst {dimension_numbers = #tpu.dot_dimension_numbers<[1], [0], [0], [1], [0, 0, 1, 1], [], []>} : vector<16x128xf32>, vector<128x128xf32>, vector<16x128xf32> -> vector<16x128xf32>
    %10 = arith.addf %8, %9 : vector<16x128xf32>
    %11 = vector.broadcast %4 : vector<1x128xf32> to vector<16x128xf32>
    %12 = arith.addf %10, %11 : vector<16x128xf32>
    %13 = math.tanh %12 : vector<16x128xf32>
    %c0_9 = arith.constant 0 : index
    %c0_10 = arith.constant 0 : index
    %14 = vector.load %arg6[%c0_9, %c0_10] : memref<16x128xf32, #tpu.memory_space<vmem>>, vector<16x128xf32>
    tpu.vector_store %arg6[%c0_9, %c0_10], %13 {strides = array<i32>} : memref<16x128xf32, #tpu.memory_space<vmem>>, vector<16x128xf32>,
    %15 = arith.index_cast %c0_i32_4 : i32 to index
    %c0_11 = arith.constant 0 : index
    %c0_12 = arith.constant 0 : index
    %16 = vector.load %arg5[%15, %c0_11, %c0_12] : memref<8x16x128xf32, #tpu.memory_space<vmem>>, vector<1x16x128xf32>
    %17 = vector.shape_cast %16 : vector<1x16x128xf32> to vector<16x128xf32>
    %18 = vector.shape_cast %13 : vector<16x128xf32> to vector<1x16x128xf32>
    tpu.vector_store %arg5[%15, %c0_11, %c0_12], %18 {strides = array<i32>} : memref<8x16x128xf32, #tpu.memory_space<vmem>>, vector<1x16x128xf32>,
    %c1_i32 = arith.constant 1 : i32
    %c0_13 = arith.constant 0 : index
    %c0_14 = arith.constant 0 : index
    %19 = vector.load %arg6[%c0_13, %c0_14] : memref<16x128xf32, #tpu.memory_space<vmem>>, vector<16x128xf32>
    %20 = arith.index_cast %c1_i32 : i32 to index
    %c0_15 = arith.constant 0 : index
    %c0_16 = arith.constant 0 : index
    %21 = vector.load %arg1[%20, %c0_15, %c0_16] : memref<8x16x128xf32, #tpu.memory_space<vmem>>, vector<1x16x128xf32>
    %22 = vector.shape_cast %21 : vector<1x16x128xf32> to vector<16x128xf32>
    %cst_17 = arith.constant dense<0.000000e+00> : vector<16x128xf32>
    %23 = tpu.matmul %19, %3, %cst_17 {dimension_numbers = #tpu.dot_dimension_numbers<[1], [0], [0], [1], [0, 0, 1, 1], [], []>} : vector<16x128xf32>, vector<128x128xf32>, vector<16x128xf32> -> vector<16x128xf32>
    %24 = arith.addf %22, %23 : vector<16x128xf32>
    %25 = vector.broadcast %4 : vector<1x128xf32> to vector<16x128xf32>
    %26 = arith.addf %24, %25 : vector<16x128xf32>
    %27 = math.tanh %26 : vector<16x128xf32>
    %c0_18 = arith.constant 0 : index
    %c0_19 = arith.constant 0 : index
    %28 = vector.load %arg6[%c0_18, %c0_19] : memref<16x128xf32, #tpu.memory_space<vmem>>, vector<16x128xf32>
    tpu.vector_store %arg6[%c0_18, %c0_19], %27 {strides = array<i32>} : memref<16x128xf32, #tpu.memory_space<vmem>>, vector<16x128xf32>,
    %29 = arith.index_cast %c1_i32 : i32 to index
    %c0_20 = arith.constant 0 : index
    %c0_21 = arith.constant 0 : index
    %30 = vector.load %arg5[%29, %c0_20, %c0_21] : memref<8x16x128xf32, #tpu.memory_space<vmem>>, vector<1x16x128xf32>
    %31 = vector.shape_cast %30 : vector<1x16x128xf32> to vector<16x128xf32>
    %32 = vector.shape_cast %27 : vector<16x128xf32> to vector<1x16x128xf32>
    tpu.vector_store %arg5[%29, %c0_20, %c0_21], %32 {strides = array<i32>} : memref<8x16x128xf32, #tpu.memory_space<vmem>>, vector<1x16x128xf32>,
    %c2_i32 = arith.constant 2 : i32
    %c0_22 = arith.constant 0 : index
    %c0_23 = arith.constant 0 : index
    %33 = vector.load %arg6[%c0_22, %c0_23] : memref<16x128xf32, #tpu.memory_space<vmem>>, vector<16x128xf32>
    %34 = arith.index_cast %c2_i32 : i32 to index
    %c0_24 = arith.constant 0 : index
    %c0_25 = arith.constant 0 : index
    %35 = vector.load %arg1[%34, %c0_24, %c0_25] : memref<8x16x128xf32, #tpu.memory_space<vmem>>, vector<1x16x128xf32>
    %36 = vector.shape_cast %35 : vector<1x16x128xf32> to vector<16x128xf32>
    %cst_26 = arith.constant dense<0.000000e+00> : vector<16x128xf32>
    %37 = tpu.matmul %33, %3, %cst_26 {dimension_numbers = #tpu.dot_dimension_numbers<[1], [0], [0], [1], [0, 0, 1, 1], [], []>} : vector<16x128xf32>, vector<128x128xf32>, vector<16x128xf32> -> vector<16x128xf32>
    %38 = arith.addf %36, %37 : vector<16x128xf32>
    %39 = vector.broadcast %4 : vector<1x128xf32> to vector<16x128xf32>
    %40 = arith.addf %38, %39 : vector<16x128xf32>
    %41 = math.tanh %40 : vector<16x128xf32>
    %c0_27 = arith.constant 0 : index
    %c0_28 = arith.constant 0 : index
    %42 = vector.load %arg6[%c0_27, %c0_28] : memref<16x128xf32, #tpu.memory_space<vmem>>, vector<16x128xf32>
    tpu.vector_store %arg6[%c0_27, %c0_28], %41 {strides = array<i32>} : memref<16x128xf32, #tpu.memory_space<vmem>>, vector<16x128xf32>,
    %43 = arith.index_cast %c2_i32 : i32 to index
    %c0_29 = arith.constant 0 : index
    %c0_30 = arith.constant 0 : index
    %44 = vector.load %arg5[%43, %c0_29, %c0_30] : memref<8x16x128xf32, #tpu.memory_space<vmem>>, vector<1x16x128xf32>
    %45 = vector.shape_cast %44 : vector<1x16x128xf32> to vector<16x128xf32>
    %46 = vector.shape_cast %41 : vector<16x128xf32> to vector<1x16x128xf32>
    tpu.vector_store %arg5[%43, %c0_29, %c0_30], %46 {strides = array<i32>} : memref<8x16x128xf32, #tpu.memory_space<vmem>>, vector<1x16x128xf32>,
    %c3_i32 = arith.constant 3 : i32
    %c0_31 = arith.constant 0 : index
    %c0_32 = arith.constant 0 : index
    %47 = vector.load %arg6[%c0_31, %c0_32] : memref<16x128xf32, #tpu.memory_space<vmem>>, vector<16x128xf32>
    %48 = arith.index_cast %c3_i32 : i32 to index
    %c0_33 = arith.constant 0 : index
    %c0_34 = arith.constant 0 : index
    %49 = vector.load %arg1[%48, %c0_33, %c0_34] : memref<8x16x128xf32, #tpu.memory_space<vmem>>, vector<1x16x128xf32>
    %50 = vector.shape_cast %49 : vector<1x16x128xf32> to vector<16x128xf32>
    %cst_35 = arith.constant dense<0.000000e+00> : vector<16x128xf32>
    %51 = tpu.matmul %47, %3, %cst_35 {dimension_numbers = #tpu.dot_dimension_numbers<[1], [0], [0], [1], [0, 0, 1, 1], [], []>} : vector<16x128xf32>, vector<128x128xf32>, vector<16x128xf32> -> vector<16x128xf32>
    %52 = arith.addf %50, %51 : vector<16x128xf32>
    %53 = vector.broadcast %4 : vector<1x128xf32> to vector<16x128xf32>
    %54 = arith.addf %52, %53 : vector<16x128xf32>
    %55 = math.tanh %54 : vector<16x128xf32>
    %c0_36 = arith.constant 0 : index
    %c0_37 = arith.constant 0 : index
    %56 = vector.load %arg6[%c0_36, %c0_37] : memref<16x128xf32, #tpu.memory_space<vmem>>, vector<16x128xf32>
    tpu.vector_store %arg6[%c0_36, %c0_37], %55 {strides = array<i32>} : memref<16x128xf32, #tpu.memory_space<vmem>>, vector<16x128xf32>,
    %57 = arith.index_cast %c3_i32 : i32 to index
    %c0_38 = arith.constant 0 : index
    %c0_39 = arith.constant 0 : index
    %58 = vector.load %arg5[%57, %c0_38, %c0_39] : memref<8x16x128xf32, #tpu.memory_space<vmem>>, vector<1x16x128xf32>
    %59 = vector.shape_cast %58 : vector<1x16x128xf32> to vector<16x128xf32>
    %60 = vector.shape_cast %55 : vector<16x128xf32> to vector<1x16x128xf32>
    tpu.vector_store %arg5[%57, %c0_38, %c0_39], %60 {strides = array<i32>} : memref<8x16x128xf32, #tpu.memory_space<vmem>>, vector<1x16x128xf32>,
    %c4_i32 = arith.constant 4 : i32
    %c0_40 = arith.constant 0 : index
    %c0_41 = arith.constant 0 : index
    %61 = vector.load %arg6[%c0_40, %c0_41] : memref<16x128xf32, #tpu.memory_space<vmem>>, vector<16x128xf32>
    %62 = arith.index_cast %c4_i32 : i32 to index
    %c0_42 = arith.constant 0 : index
    %c0_43 = arith.constant 0 : index
    %63 = vector.load %arg1[%62, %c0_42, %c0_43] : memref<8x16x128xf32, #tpu.memory_space<vmem>>, vector<1x16x128xf32>
    %64 = vector.shape_cast %63 : vector<1x16x128xf32> to vector<16x128xf32>
    %cst_44 = arith.constant dense<0.000000e+00> : vector<16x128xf32>
    %65 = tpu.matmul %61, %3, %cst_44 {dimension_numbers = #tpu.dot_dimension_numbers<[1], [0], [0], [1], [0, 0, 1, 1], [], []>} : vector<16x128xf32>, vector<128x128xf32>, vector<16x128xf32> -> vector<16x128xf32>
    %66 = arith.addf %64, %65 : vector<16x128xf32>
    %67 = vector.broadcast %4 : vector<1x128xf32> to vector<16x128xf32>
    %68 = arith.addf %66, %67 : vector<16x128xf32>
    %69 = math.tanh %68 : vector<16x128xf32>
    %c0_45 = arith.constant 0 : index
    %c0_46 = arith.constant 0 : index
    %70 = vector.load %arg6[%c0_45, %c0_46] : memref<16x128xf32, #tpu.memory_space<vmem>>, vector<16x128xf32>
    tpu.vector_store %arg6[%c0_45, %c0_46], %69 {strides = array<i32>} : memref<16x128xf32, #tpu.memory_space<vmem>>, vector<16x128xf32>,
    %71 = arith.index_cast %c4_i32 : i32 to index
    %c0_47 = arith.constant 0 : index
    %c0_48 = arith.constant 0 : index
    %72 = vector.load %arg5[%71, %c0_47, %c0_48] : memref<8x16x128xf32, #tpu.memory_space<vmem>>, vector<1x16x128xf32>
    %73 = vector.shape_cast %72 : vector<1x16x128xf32> to vector<16x128xf32>
    %74 = vector.shape_cast %69 : vector<16x128xf32> to vector<1x16x128xf32>
    tpu.vector_store %arg5[%71, %c0_47, %c0_48], %74 {strides = array<i32>} : memref<8x16x128xf32, #tpu.memory_space<vmem>>, vector<1x16x128xf32>,
    %c5_i32 = arith.constant 5 : i32
    %c0_49 = arith.constant 0 : index
    %c0_50 = arith.constant 0 : index
    %75 = vector.load %arg6[%c0_49, %c0_50] : memref<16x128xf32, #tpu.memory_space<vmem>>, vector<16x128xf32>
    %76 = arith.index_cast %c5_i32 : i32 to index
    %c0_51 = arith.constant 0 : index
    %c0_52 = arith.constant 0 : index
    %77 = vector.load %arg1[%76, %c0_51, %c0_52] : memref<8x16x128xf32, #tpu.memory_space<vmem>>, vector<1x16x128xf32>
    %78 = vector.shape_cast %77 : vector<1x16x128xf32> to vector<16x128xf32>
    %cst_53 = arith.constant dense<0.000000e+00> : vector<16x128xf32>
    %79 = tpu.matmul %75, %3, %cst_53 {dimension_numbers = #tpu.dot_dimension_numbers<[1], [0], [0], [1], [0, 0, 1, 1], [], []>} : vector<16x128xf32>, vector<128x128xf32>, vector<16x128xf32> -> vector<16x128xf32>
    %80 = arith.addf %78, %79 : vector<16x128xf32>
    %81 = vector.broadcast %4 : vector<1x128xf32> to vector<16x128xf32>
    %82 = arith.addf %80, %81 : vector<16x128xf32>
    %83 = math.tanh %82 : vector<16x128xf32>
    %c0_54 = arith.constant 0 : index
    %c0_55 = arith.constant 0 : index
    %84 = vector.load %arg6[%c0_54, %c0_55] : memref<16x128xf32, #tpu.memory_space<vmem>>, vector<16x128xf32>
    tpu.vector_store %arg6[%c0_54, %c0_55], %83 {strides = array<i32>} : memref<16x128xf32, #tpu.memory_space<vmem>>, vector<16x128xf32>,
    %85 = arith.index_cast %c5_i32 : i32 to index
    %c0_56 = arith.constant 0 : index
    %c0_57 = arith.constant 0 : index
    %86 = vector.load %arg5[%85, %c0_56, %c0_57] : memref<8x16x128xf32, #tpu.memory_space<vmem>>, vector<1x16x128xf32>
    %87 = vector.shape_cast %86 : vector<1x16x128xf32> to vector<16x128xf32>
    %88 = vector.shape_cast %83 : vector<16x128xf32> to vector<1x16x128xf32>
    tpu.vector_store %arg5[%85, %c0_56, %c0_57], %88 {strides = array<i32>} : memref<8x16x128xf32, #tpu.memory_space<vmem>>, vector<1x16x128xf32>,
    %c6_i32 = arith.constant 6 : i32
    %c0_58 = arith.constant 0 : index
    %c0_59 = arith.constant 0 : index
    %89 = vector.load %arg6[%c0_58, %c0_59] : memref<16x128xf32, #tpu.memory_space<vmem>>, vector<16x128xf32>
    %90 = arith.index_cast %c6_i32 : i32 to index
    %c0_60 = arith.constant 0 : index
    %c0_61 = arith.constant 0 : index
    %91 = vector.load %arg1[%90, %c0_60, %c0_61] : memref<8x16x128xf32, #tpu.memory_space<vmem>>, vector<1x16x128xf32>
    %92 = vector.shape_cast %91 : vector<1x16x128xf32> to vector<16x128xf32>
    %cst_62 = arith.constant dense<0.000000e+00> : vector<16x128xf32>
    %93 = tpu.matmul %89, %3, %cst_62 {dimension_numbers = #tpu.dot_dimension_numbers<[1], [0], [0], [1], [0, 0, 1, 1], [], []>} : vector<16x128xf32>, vector<128x128xf32>, vector<16x128xf32> -> vector<16x128xf32>
    %94 = arith.addf %92, %93 : vector<16x128xf32>
    %95 = vector.broadcast %4 : vector<1x128xf32> to vector<16x128xf32>
    %96 = arith.addf %94, %95 : vector<16x128xf32>
    %97 = math.tanh %96 : vector<16x128xf32>
    %c0_63 = arith.constant 0 : index
    %c0_64 = arith.constant 0 : index
    %98 = vector.load %arg6[%c0_63, %c0_64] : memref<16x128xf32, #tpu.memory_space<vmem>>, vector<16x128xf32>
    tpu.vector_store %arg6[%c0_63, %c0_64], %97 {strides = array<i32>} : memref<16x128xf32, #tpu.memory_space<vmem>>, vector<16x128xf32>,
    %99 = arith.index_cast %c6_i32 : i32 to index
    %c0_65 = arith.constant 0 : index
    %c0_66 = arith.constant 0 : index
    %100 = vector.load %arg5[%99, %c0_65, %c0_66] : memref<8x16x128xf32, #tpu.memory_space<vmem>>, vector<1x16x128xf32>
    %101 = vector.shape_cast %100 : vector<1x16x128xf32> to vector<16x128xf32>
    %102 = vector.shape_cast %97 : vector<16x128xf32> to vector<1x16x128xf32>
    tpu.vector_store %arg5[%99, %c0_65, %c0_66], %102 {strides = array<i32>} : memref<8x16x128xf32, #tpu.memory_space<vmem>>, vector<1x16x128xf32>,
    %c7_i32 = arith.constant 7 : i32
    %c0_67 = arith.constant 0 : index
    %c0_68 = arith.constant 0 : index
    %103 = vector.load %arg6[%c0_67, %c0_68] : memref<16x128xf32, #tpu.memory_space<vmem>>, vector<16x128xf32>
    %104 = arith.index_cast %c7_i32 : i32 to index
    %c0_69 = arith.constant 0 : index
    %c0_70 = arith.constant 0 : index
    %105 = vector.load %arg1[%104, %c0_69, %c0_70] : memref<8x16x128xf32, #tpu.memory_space<vmem>>, vector<1x16x128xf32>
    %106 = vector.shape_cast %105 : vector<1x16x128xf32> to vector<16x128xf32>
    %cst_71 = arith.constant dense<0.000000e+00> : vector<16x128xf32>
    %107 = tpu.matmul %103, %3, %cst_71 {dimension_numbers = #tpu.dot_dimension_numbers<[1], [0], [0], [1], [0, 0, 1, 1], [], []>} : vector<16x128xf32>, vector<128x128xf32>, vector<16x128xf32> -> vector<16x128xf32>
    %108 = arith.addf %106, %107 : vector<16x128xf32>
    %109 = vector.broadcast %4 : vector<1x128xf32> to vector<16x128xf32>
    %110 = arith.addf %108, %109 : vector<16x128xf32>
    %111 = math.tanh %110 : vector<16x128xf32>
    %c0_72 = arith.constant 0 : index
    %c0_73 = arith.constant 0 : index
    %112 = vector.load %arg6[%c0_72, %c0_73] : memref<16x128xf32, #tpu.memory_space<vmem>>, vector<16x128xf32>
    tpu.vector_store %arg6[%c0_72, %c0_73], %111 {strides = array<i32>} : memref<16x128xf32, #tpu.memory_space<vmem>>, vector<16x128xf32>,
    %113 = arith.index_cast %c7_i32 : i32 to index
    %c0_74 = arith.constant 0 : index
    %c0_75 = arith.constant 0 : index
    %114 = vector.load %arg5[%113, %c0_74, %c0_75] : memref<8x16x128xf32, #tpu.memory_space<vmem>>, vector<1x16x128xf32>
    %115 = vector.shape_cast %114 : vector<1x16x128xf32> to vector<16x128xf32>
    %116 = vector.shape_cast %111 : vector<16x128xf32> to vector<1x16x128xf32>
    tpu.vector_store %arg5[%113, %c0_74, %c0_75], %116 {strides = array<i32>} : memref<8x16x128xf32, #tpu.memory_space<vmem>>, vector<1x16x128xf32>,
    %c8_i32 = arith.constant 8 : i32
    return
  }
  func.func @transform_0(%arg0: i32) -> (i32, i32, i32) {
    %c0_i32 = arith.constant 0 : i32
    %c0_i32_0 = arith.constant 0 : i32
    %c0_i32_1 = arith.constant 0 : i32
    return %arg0, %c0_i32, %c0_i32_0 : i32, i32, i32
  }
  func.func @transform_1(%arg0: i32) -> (i32, i32) {
    %c0_i32 = arith.constant 0 : i32
    %c0_i32_0 = arith.constant 0 : i32
    %c0_i32_1 = arith.constant 0 : i32
    return %c0_i32, %c0_i32_0 : i32, i32
  }
  func.func @transform_2(%arg0: i32) -> (i32, i32) {
    %c0_i32 = arith.constant 0 : i32
    %c0_i32_0 = arith.constant 0 : i32
    %c0_i32_1 = arith.constant 0 : i32
    return %c0_i32, %c0_i32_0 : i32, i32
  }
  func.func @transform_3(%arg0: i32) -> (i32, i32) {
    %c0_i32 = arith.constant 0 : i32
    %c0_i32_0 = arith.constant 0 : i32
    %c0_i32_1 = arith.constant 0 : i32
    return %c0_i32, %c0_i32_0 : i32, i32
  }
  func.func @transform_4(%arg0: i32) -> (i32, i32, i32) {
    %c0_i32 = arith.constant 0 : i32
    %c0_i32_0 = arith.constant 0 : i32
    %c0_i32_1 = arith.constant 0 : i32
    return %arg0, %c0_i32, %c0_i32_0 : i32, i32, i32
  }
}

</mosaic_0001>

<bundles_post_ra>
// kernel: rnn_forward_sequence.3
= control target key start
LH: loop header
LB: loop body
LE: loop exit
PB: predicated region body
PF: predicated region fallthrough
CT: control target
= control target key end

     0   :  { %s284_s1 = inlined_call_operand.vmem [shape: f32[128,128], index: 1, kind: input, shape index: {}]   ;;  %s285_s0 = inlined_call_operand.vmem [shape: f32[16,128], index: 0, kind: input, shape index: {}]   ;;  %s286_s2 = inlined_call_operand.vmem [shape: f32[16,128], index: 2, kind: output, shape index: {}]  }
   0x1   :  { %v21_v0 = vld [vmem:[%s284_s1] sm:$0xff]  ;;  %v22_v1 = vld [vmem:[%s284_s1 + $0x8] sm:$0xff]  ;;  %v23_v2 = vld [vmem:[%s284_s1 + $0x10] sm:$0xff] }
   0x2   :  { %v177_v3 = vpack.c.bf16 %v22_v1, %v21_v0  ;;  %v24_v4 = vld [vmem:[%s284_s1 + $0x18] sm:$0xff]  ;;  %v25_v6 = vld [vmem:[%s284_s1 + $0x20] sm:$0xff]  ;;  %v26_v7 = vld [vmem:[%s284_s1 + $0x28] sm:$0xff] }
   0x3   :  { %v181_v5 = vpack.c.bf16 %v24_v4, %v23_v2  ;;  %v185_v8 = vpack.c.bf16 %v26_v7, %v25_v6  ;;  %v19_v9 = vld [vmem:[%s285_s0] sm:$0xff]  ;;  %v27_v10 = vld [vmem:[%s284_s1 + $0x30] sm:$0xff]  ;;  %v28_v11 = vld [vmem:[%s284_s1 + $0x38] sm:$0xff] }
   0x4   :  { %178 = vmatprep.subr.bf16.mxu0 %v177_v3  ;;  %174 = vmatprep.mubr.f32.mxu0 %v19_v9  ;;  %v189_v12 = vpack.c.bf16 %v28_v11, %v27_v10  ;;  %v29_v13 = vld [vmem:[%s284_s1 + $0x40] sm:$0xff]  ;;  %v30_v14 = vld [vmem:[%s284_s1 + $0x48] sm:$0xff]  ;;  %v31_v16 = vld [vmem:[%s284_s1 + $0x50] sm:$0xff] }
   0x5   :  { %180 = vmatpush3.bf16.msra.mxu0 %v177_v3  ;;  %v193_v15 = vpack.c.bf16 %v30_v14, %v29_v13  ;;  %v32_v17 = vld [vmem:[%s284_s1 + $0x58] sm:$0xff]  ;;  %v33_v19 = vld [vmem:[%s284_s1 + $0x60] sm:$0xff]  ;;  %v34_v20 = vld [vmem:[%s284_s1 + $0x68] sm:$0xff] }
   0x6   :  { %182 = vmatprep.subr.bf16.mxu0 %v181_v5  ;;  %v197_v18 = vpack.c.bf16 %v32_v17, %v31_v16  ;;  %v201_v21 = vpack.c.bf16 %v34_v20, %v33_v19  ;;  %v35_v22 = vld [vmem:[%s284_s1 + $0x70] sm:$0xff]  ;;  %v36_v23 = vld [vmem:[%s284_s1 + $0x78] sm:$0xff]  ;;  %v20_v25 = vld [vmem:[%s285_s0 + $0x8] sm:$0xff] }
   0x7   :  { %v205_v24 = vpack.c.bf16 %v36_v23, %v35_v22 }
   0x9   :  { %184 = vmatpush3.bf16.msra.mxu0 %v181_v5 }
   0xa   :  { %186 = vmatprep.subr.bf16.mxu0 %v185_v8 }
   0xd   :  { %188 = vmatpush3.bf16.msra.mxu0 %v185_v8 }
   0xe   :  { %190 = vmatprep.subr.bf16.mxu0 %v189_v12 }
  0x11   :  { %192 = vmatpush3.bf16.msra.mxu0 %v189_v12 }
  0x12   :  { %194 = vmatprep.subr.bf16.mxu0 %v193_v15 }
  0x15   :  { %196 = vmatpush3.bf16.msra.mxu0 %v193_v15 }
  0x16   :  { %198 = vmatprep.subr.bf16.mxu0 %v197_v18 }
  0x19   :  { %200 = vmatpush3.bf16.msra.mxu0 %v197_v18 }
  0x1a   :  { %202 = vmatprep.subr.bf16.mxu0 %v201_v21 }
  0x1d   :  { %204 = vmatpush3.bf16.msra.mxu0 %v201_v21 }
  0x1e   :  { %206 = vmatprep.subr.bf16.mxu0 %v205_v24 }
  0x21   :  { %208 = vmatpush3.bf16.msra.mxu0 %v205_v24 }
  0x24   :  { %175 = vmatmul.mubr.f32.vlgmr.msra.gmra.mrb[0].mxu0 %v20_v25 }
  0xf7   :  { %v176_v26 = vpop.f32.mrb[0].mxu0 }
  0xf8   :  { %119 = vst [vmem:[%s286_s2 + $0x8] sm:$0xff] %v176_v26  ;;  %v103_v27 = vpop.f32.mrb[1].mxu0 }
  0xf9   :  { %118 = vst [vmem:[%s286_s2] sm:$0xff] %v103_v27 }

// kernel: rnn_forward_sequence.4
= control target key start
LH: loop header
LB: loop body
LE: loop exit
PB: predicated region body
PF: predicated region fallthrough
CT: control target
= control target key end

     0   :  { %s1859_s2 = inlined_call_operand.vmem [shape: f32[128,128], index: 2, kind: input, shape index: {}]   ;;  %s1860_s1 = inlined_call_operand.vmem [shape: f32[16,128], index: 1, kind: input, shape index: {}]   ;;  %s1861_s0 = inlined_call_operand.vmem [shape: f32[8,16,128], index: 0, kind: input, shape index: {}]   ;;  %s1862_s3 = inlined_call_operand.vmem [shape: f32[1,128], index: 3, kind: input, shape index: {}]   ;;  %s1863_s4 = inlined_call_operand.vmem [shape: f32[8,16,128], index: 4, kind: output, shape index: {}]  }
   0x1   :  { %v25_v0 = vld [vmem:[%s1859_s2] sm:$0xff]  ;;  %v26_v1 = vld [vmem:[%s1859_s2 + $0x8] sm:$0xff]  ;;  %v27_v2 = vld [vmem:[%s1859_s2 + $0x10] sm:$0xff] }
   0x2   :  { %v1553_v3 = vpack.c.bf16 %v26_v1, %v25_v0  ;;  %v28_v4 = vld [vmem:[%s1859_s2 + $0x18] sm:$0xff]  ;;  %v29_v6 = vld [vmem:[%s1859_s2 + $0x20] sm:$0xff]  ;;  %v30_v7 = vld [vmem:[%s1859_s2 + $0x28] sm:$0xff] }
   0x3   :  { %v1558_v5 = vpack.c.bf16 %v28_v4, %v27_v2  ;;  %v1571_v8 = vpack.c.bf16 %v30_v7, %v29_v6  ;;  %v21_v9 = vld [vmem:[%s1860_s1] sm:$0xff]  ;;  %v31_v10 = vld [vmem:[%s1859_s2 + $0x30] sm:$0xff]  ;;  %v32_v11 = vld [vmem:[%s1859_s2 + $0x38] sm:$0xff] }
   0x4   :  { %1232 = vmatprep.subr.bf16.mxu0 %v1553_v3  ;;  %1264 = vmatprep.subr.bf16.mxu1 %v1553_v3  ;;  %v1586_v12 = vpack.c.bf16 %v32_v11, %v31_v10  ;;  %v33_v13 = vld [vmem:[%s1859_s2 + $0x40] sm:$0xff]  ;;  %v34_v14 = vld [vmem:[%s1859_s2 + $0x48] sm:$0xff]  ;;  %v35_v16 = vld [vmem:[%s1859_s2 + $0x50] sm:$0xff] }
   0x5   :  { %1234 = vmatpush3.bf16.msra.mxu0 %v1553_v3  ;;  %1266 = vmatpush3.bf16.msra.mxu1 %v1553_v3  ;;  %v1598_v15 = vpack.c.bf16 %v34_v14, %v33_v13  ;;  %v36_v17 = vld [vmem:[%s1859_s2 + $0x58] sm:$0xff]  ;;  %v37_v19 = vld [vmem:[%s1859_s2 + $0x60] sm:$0xff]  ;;  %v38_v20 = vld [vmem:[%s1859_s2 + $0x68] sm:$0xff] }
   0x6   :  { %1236 = vmatprep.subr.bf16.mxu0 %v1558_v5  ;;  %1268 = vmatprep.subr.bf16.mxu1 %v1558_v5  ;;  %v1610_v18 = vpack.c.bf16 %v36_v17, %v35_v16  ;;  %v1622_v21 = vpack.c.bf16 %v38_v20, %v37_v19  ;;  %v39_v22 = vld [vmem:[%s1859_s2 + $0x70] sm:$0xff]  ;;  %v40_v23 = vld [vmem:[%s1859_s2 + $0x78] sm:$0xff]  ;;  %v22_v25 = vld [vmem:[%s1860_s1 + $0x8] sm:$0xff] }
   0x7   :  { %983 = vmatprep.mubr.f32.mxu0 %v21_v9  ;;  %v1634_v24 = vpack.c.bf16 %v40_v23, %v39_v22  ;;  %v45_v26 = vld [vmem:[%s1861_s0 + $0x8] sm:$0xff]  ;;  %v44_v27 = vld [vmem:[%s1861_s0] sm:$0xff]  ;;  %v780_v37 = vld [vmem:[%s1861_s0 + $0x18] sm:$0xff] }
   0x8   :  { %v1673_v28 = vld [vmem:[%s1862_s3] ss:$0 sm:$0xff]  ;;  %v779_v38 = vld [vmem:[%s1861_s0 + $0x10] sm:$0xff]  ;;  %v784_v47 = vld [vmem:[%s1861_s0 + $0x28] sm:$0xff] }
   0x9   :  { %1238 = vmatpush3.bf16.msra.mxu0 %v1558_v5  ;;  %1270 = vmatpush3.bf16.msra.mxu1 %v1558_v5  ;;  %v783_v48 = vld [vmem:[%s1861_s0 + $0x20] sm:$0xff]  ;;  %v788_v57 = vld [vmem:[%s1861_s0 + $0x38] sm:$0xff]  ;;  %v787_v58 = vld [vmem:[%s1861_s0 + $0x30] sm:$0xff] }
   0xa   :  { %1240 = vmatprep.subr.bf16.mxu0 %v1571_v8  ;;  %1272 = vmatprep.subr.bf16.mxu1 %v1571_v8  ;;  %v792_v4 = vld [vmem:[%s1861_s0 + $0x48] sm:$0xff]  ;;  %v791_v6 = vld [vmem:[%s1861_s0 + $0x40] sm:$0xff] }
   0xb   :  { %v800_v23 = vld [vmem:[%s1861_s0 + $0x68] sm:$0xff] }
   0xd   :  { %1242 = vmatpush3.bf16.msra.mxu0 %v1571_v8  ;;  %1274 = vmatpush3.bf16.msra.mxu1 %v1571_v8 }
   0xe   :  { %1244 = vmatprep.subr.bf16.mxu0 %v1586_v12  ;;  %1276 = vmatprep.subr.bf16.mxu1 %v1586_v12 }
  0x11   :  { %1246 = vmatpush3.bf16.msra.mxu0 %v1586_v12  ;;  %1278 = vmatpush3.bf16.msra.mxu1 %v1586_v12 }
  0x12   :  { %1248 = vmatprep.subr.bf16.mxu0 %v1598_v15  ;;  %1280 = vmatprep.subr.bf16.mxu1 %v1598_v15 }
  0x15   :  { %1250 = vmatpush3.bf16.msra.mxu0 %v1598_v15  ;;  %1282 = vmatpush3.bf16.msra.mxu1 %v1598_v15 }
  0x16   :  { %1252 = vmatprep.subr.bf16.mxu0 %v1610_v18  ;;  %1284 = vmatprep.subr.bf16.mxu1 %v1610_v18 }
  0x19   :  { %1254 = vmatpush3.bf16.msra.mxu0 %v1610_v18  ;;  %1286 = vmatpush3.bf16.msra.mxu1 %v1610_v18 }
  0x1a   :  { %1256 = vmatprep.subr.bf16.mxu0 %v1622_v21  ;;  %1288 = vmatprep.subr.bf16.mxu1 %v1622_v21 }
  0x1d   :  { %1258 = vmatpush3.bf16.msra.mxu0 %v1622_v21  ;;  %1290 = vmatpush3.bf16.msra.mxu1 %v1622_v21 }
  0x1e   :  { %1260 = vmatprep.subr.bf16.mxu0 %v1634_v24  ;;  %1292 = vmatprep.subr.bf16.mxu1 %v1634_v24 }
  0x21   :  { %1262 = vmatpush3.bf16.msra.mxu0 %v1634_v24  ;;  %1294 = vmatpush3.bf16.msra.mxu1 %v1634_v24 }
  0x22   :  { %1296 = vmatprep.subr.bf16.mxu0 %v1553_v3  ;;  %1328 = vmatprep.subr.bf16.mxu1 %v1553_v3 }
  0x24   :  { %984 = vmatmul.mubr.f32.vlgmr.msra.gmra.mrb[0].mxu0 %v22_v25 }
  0x25   :  { %1298 = vmatpush3.bf16.msra.mxu0 %v1553_v3 }
  0x26   :  { %1300 = vmatprep.subr.bf16.mxu0 %v1558_v5 }
  0x29   :  { %1302 = vmatpush3.bf16.msra.mxu0 %v1558_v5 }
  0x2a   :  { %1304 = vmatprep.subr.bf16.mxu0 %v1571_v8 }
  0x2d   :  { %1306 = vmatpush3.bf16.msra.mxu0 %v1571_v8 }
  0x2e   :  { %1308 = vmatprep.subr.bf16.mxu0 %v1586_v12 }
  0x31   :  { %1310 = vmatpush3.bf16.msra.mxu0 %v1586_v12 }
  0x32   :  { %1312 = vmatprep.subr.bf16.mxu0 %v1598_v15 }
  0x35   :  { %1314 = vmatpush3.bf16.msra.mxu0 %v1598_v15 }
  0x36   :  { %1316 = vmatprep.subr.bf16.mxu0 %v1610_v18 }
  0x39   :  { %1318 = vmatpush3.bf16.msra.mxu0 %v1610_v18 }
  0x3a   :  { %1320 = vmatprep.subr.bf16.mxu0 %v1622_v21 }
  0x3d   :  { %1322 = vmatpush3.bf16.msra.mxu0 %v1622_v21 }
  0x3e   :  { %1324 = vmatprep.subr.bf16.mxu0 %v1634_v24 }
  0x41   :  { %1326 = vmatpush3.bf16.msra.mxu0 %v1634_v24 }
  0x42   :  { %1360 = vmatprep.subr.bf16.mxu0 %v1553_v3 }
  0xf7   :  { %v985_v29 = vpop.f32.mrb[0].mxu0 }
  0xf8   :  { %v122_v30 = vadd.f32 %v985_v29, %v45_v26  ;;  %v112_v31 = vpop.f32.mrb[1].mxu0 }
  0xf9   :  { %v121_v32 = vadd.f32 %v112_v31, %v44_v27 }
  0xfa   :  { %v130_v33 = vadd.f32 %v1673_v28, %v122_v30 }
  0xfb   :  { %v129_v34 = vadd.f32 %v1673_v28, %v121_v32 }
  0xfc   :  { %1487 = vtanh.f32 %v130_v33 }
  0xfd   :  { %1489 = vtanh.f32 %v129_v34  ;;  %v804_v34 = vld [vmem:[%s1861_s0 + $0x78] sm:$0xff] }
 0x106   :  { %v1488_v35 = vpop.eup %1487 }
 0x107   :  { %v1490_v36 = vpop.eup %1489  ;;  %136 = vst [vmem:[%s1863_s4 + $0x8] sm:$0xff] %v1488_v35 }
 0x108   :  { %135 = vst [vmem:[%s1863_s4] sm:$0xff] %v1490_v36  ;;  %1018 = vmatprep.mubr.f32.mxu1 %v1490_v36 }
 0x109   :  { %1019 = vmatmul.mubr.f32.vlgmr.msra.gmra.mrb[0].mxu1 %v1488_v35  ;;  %v803_v35 = vld [vmem:[%s1861_s0 + $0x70] sm:$0xff] }
 0x10a   :  { %1330 = vmatpush3.bf16.msra.mxu1 %v1553_v3 }
 0x10b   :  { %1332 = vmatprep.subr.bf16.mxu1 %v1558_v5 }
 0x10e   :  { %1334 = vmatpush3.bf16.msra.mxu1 %v1558_v5 }
 0x10f   :  { %1336 = vmatprep.subr.bf16.mxu1 %v1571_v8 }
 0x112   :  { %1338 = vmatpush3.bf16.msra.mxu1 %v1571_v8 }
 0x113   :  { %1340 = vmatprep.subr.bf16.mxu1 %v1586_v12 }
 0x116   :  { %1342 = vmatpush3.bf16.msra.mxu1 %v1586_v12 }
 0x117   :  { %1344 = vmatprep.subr.bf16.mxu1 %v1598_v15 }
 0x11a   :  { %1346 = vmatpush3.bf16.msra.mxu1 %v1598_v15 }
 0x11b   :  { %1348 = vmatprep.subr.bf16.mxu1 %v1610_v18 }
 0x11e   :  { %1350 = vmatpush3.bf16.msra.mxu1 %v1610_v18 }
 0x11f   :  { %1352 = vmatprep.subr.bf16.mxu1 %v1622_v21 }
 0x122   :  { %1354 = vmatpush3.bf16.msra.mxu1 %v1622_v21 }
 0x123   :  { %1356 = vmatprep.subr.bf16.mxu1 %v1634_v24 }
 0x126   :  { %1358 = vmatpush3.bf16.msra.mxu1 %v1634_v24 }
 0x127   :  { %1392 = vmatprep.subr.bf16.mxu1 %v1553_v3 }
 0x1dc   :  { %v1020_v39 = vpop.f32.mrb[0].mxu1 }
 0x1dd   :  { %v218_v40 = vadd.f32 %v1020_v39, %v780_v37  ;;  %v208_v41 = vpop.f32.mrb[1].mxu1 }
 0x1de   :  { %v217_v42 = vadd.f32 %v779_v38, %v208_v41 }
 0x1df   :  { %v220_v43 = vadd.f32 %v1673_v28, %v218_v40 }
 0x1e0   :  { %v219_v44 = vadd.f32 %v1673_v28, %v217_v42 }
 0x1e1   :  { %1491 = vtanh.f32 %v220_v43 }
 0x1e2   :  { %1493 = vtanh.f32 %v219_v44 }
 0x1eb   :  { %v1492_v45 = vpop.eup %1491 }
 0x1ec   :  { %v1494_v46 = vpop.eup %1493  ;;  %782 = vst [vmem:[%s1863_s4 + $0x18] sm:$0xff] %v1492_v45 }
 0x1ed   :  { %781 = vst [vmem:[%s1863_s4 + $0x10] sm:$0xff] %v1494_v46  ;;  %1053 = vmatprep.mubr.f32.mxu0 %v1494_v46 }
 0x1ee   :  { %1054 = vmatmul.mubr.f32.vlgmr.msra.gmra.mrb[2].mxu0 %v1492_v45 }
 0x1ef   :  { %1362 = vmatpush3.bf16.msra.mxu0 %v1553_v3 }
 0x1f0   :  { %1364 = vmatprep.subr.bf16.mxu0 %v1558_v5 }
 0x1f3   :  { %1366 = vmatpush3.bf16.msra.mxu0 %v1558_v5 }
 0x1f4   :  { %1368 = vmatprep.subr.bf16.mxu0 %v1571_v8 }
 0x1f7   :  { %1370 = vmatpush3.bf16.msra.mxu0 %v1571_v8 }
 0x1f8   :  { %1372 = vmatprep.subr.bf16.mxu0 %v1586_v12 }
 0x1fb   :  { %1374 = vmatpush3.bf16.msra.mxu0 %v1586_v12 }
 0x1fc   :  { %1376 = vmatprep.subr.bf16.mxu0 %v1598_v15 }
 0x1ff   :  { %1378 = vmatpush3.bf16.msra.mxu0 %v1598_v15 }
 0x200   :  { %1380 = vmatprep.subr.bf16.mxu0 %v1610_v18 }
 0x203   :  { %1382 = vmatpush3.bf16.msra.mxu0 %v1610_v18 }
 0x204   :  { %1384 = vmatprep.subr.bf16.mxu0 %v1622_v21 }
 0x207   :  { %1386 = vmatpush3.bf16.msra.mxu0 %v1622_v21 }
 0x208   :  { %1388 = vmatprep.subr.bf16.mxu0 %v1634_v24 }
 0x20b   :  { %1390 = vmatpush3.bf16.msra.mxu0 %v1634_v24 }
 0x20c   :  { %1424 = vmatprep.subr.bf16.mxu0 %v1553_v3 }
 0x2c1   :  { %v1055_v49 = vpop.f32.mrb[2].mxu0 }
 0x2c2   :  { %v309_v50 = vadd.f32 %v1055_v49, %v784_v47  ;;  %v299_v51 = vpop.f32.mrb[3].mxu0 }
 0x2c3   :  { %v308_v52 = vadd.f32 %v783_v48, %v299_v51 }
 0x2c4   :  { %v311_v53 = vadd.f32 %v1673_v28, %v309_v50 }
 0x2c5   :  { %v310_v54 = vadd.f32 %v1673_v28, %v308_v52 }
 0x2c6   :  { %1495 = vtanh.f32 %v311_v53 }
 0x2c7   :  { %1497 = vtanh.f32 %v310_v54 }
 0x2d0   :  { %v1496_v55 = vpop.eup %1495 }
 0x2d1   :  { %v1498_v56 = vpop.eup %1497  ;;  %786 = vst [vmem:[%s1863_s4 + $0x28] sm:$0xff] %v1496_v55 }
 0x2d2   :  { %785 = vst [vmem:[%s1863_s4 + $0x20] sm:$0xff] %v1498_v56  ;;  %1088 = vmatprep.mubr.f32.mxu1 %v1498_v56 }
 0x2d3   :  { %1089 = vmatmul.mubr.f32.vlgmr.msra.gmra.mrb[2].mxu1 %v1496_v55 }
 0x2d4   :  { %1394 = vmatpush3.bf16.msra.mxu1 %v1553_v3 }
 0x2d5   :  { %1396 = vmatprep.subr.bf16.mxu1 %v1558_v5 }
 0x2d8   :  { %1398 = vmatpush3.bf16.msra.mxu1 %v1558_v5 }
 0x2d9   :  { %1400 = vmatprep.subr.bf16.mxu1 %v1571_v8 }
 0x2dc   :  { %1402 = vmatpush3.bf16.msra.mxu1 %v1571_v8 }
 0x2dd   :  { %1404 = vmatprep.subr.bf16.mxu1 %v1586_v12 }
 0x2e0   :  { %1406 = vmatpush3.bf16.msra.mxu1 %v1586_v12 }
 0x2e1   :  { %1408 = vmatprep.subr.bf16.mxu1 %v1598_v15 }
 0x2e4   :  { %1410 = vmatpush3.bf16.msra.mxu1 %v1598_v15 }
 0x2e5   :  { %1412 = vmatprep.subr.bf16.mxu1 %v1610_v18 }
 0x2e8   :  { %1414 = vmatpush3.bf16.msra.mxu1 %v1610_v18 }
 0x2e9   :  { %1416 = vmatprep.subr.bf16.mxu1 %v1622_v21 }
 0x2ec   :  { %1418 = vmatpush3.bf16.msra.mxu1 %v1622_v21 }
 0x2ed   :  { %1420 = vmatprep.subr.bf16.mxu1 %v1634_v24 }
 0x2f0   :  { %1422 = vmatpush3.bf16.msra.mxu1 %v1634_v24 }
 0x2f1   :  { %1456 = vmatprep.subr.bf16.mxu1 %v1553_v3 }
 0x3a6   :  { %v1090_v59 = vpop.f32.mrb[2].mxu1 }
 0x3a7   :  { %v400_v60 = vadd.f32 %v1090_v59, %v788_v57  ;;  %v390_v61 = vpop.f32.mrb[3].mxu1 }
 0x3a8   :  { %v399_v62 = vadd.f32 %v787_v58, %v390_v61 }
 0x3a9   :  { %v402_v63 = vadd.f32 %v1673_v28, %v400_v60 }
 0x3aa   :  { %v401_v0 = vadd.f32 %v1673_v28, %v399_v62 }
 0x3ab   :  { %1499 = vtanh.f32 %v402_v63 }
 0x3ac   :  { %1501 = vtanh.f32 %v401_v0 }
 0x3b5   :  { %v1500_v1 = vpop.eup %1499 }
 0x3b6   :  { %v1502_v2 = vpop.eup %1501  ;;  %790 = vst [vmem:[%s1863_s4 + $0x38] sm:$0xff] %v1500_v1 }
 0x3b7   :  { %789 = vst [vmem:[%s1863_s4 + $0x30] sm:$0xff] %v1502_v2  ;;  %1123 = vmatprep.mubr.f32.mxu0 %v1502_v2 }
 0x3b8   :  { %1124 = vmatmul.mubr.f32.vlgmr.msra.gmra.mrb[4].mxu0 %v1500_v1 }
 0x3b9   :  { %1426 = vmatpush3.bf16.msra.mxu0 %v1553_v3 }
 0x3ba   :  { %1428 = vmatprep.subr.bf16.mxu0 %v1558_v5 }
 0x3bd   :  { %1430 = vmatpush3.bf16.msra.mxu0 %v1558_v5 }
 0x3be   :  { %1432 = vmatprep.subr.bf16.mxu0 %v1571_v8 }
 0x3c1   :  { %1434 = vmatpush3.bf16.msra.mxu0 %v1571_v8 }
 0x3c2   :  { %1436 = vmatprep.subr.bf16.mxu0 %v1586_v12 }
 0x3c5   :  { %1438 = vmatpush3.bf16.msra.mxu0 %v1586_v12 }
 0x3c6   :  { %1440 = vmatprep.subr.bf16.mxu0 %v1598_v15 }
 0x3c9   :  { %1442 = vmatpush3.bf16.msra.mxu0 %v1598_v15 }
 0x3ca   :  { %1444 = vmatprep.subr.bf16.mxu0 %v1610_v18 }
 0x3cd   :  { %1446 = vmatpush3.bf16.msra.mxu0 %v1610_v18 }
 0x3ce   :  { %1448 = vmatprep.subr.bf16.mxu0 %v1622_v21 }
 0x3d1   :  { %1450 = vmatpush3.bf16.msra.mxu0 %v1622_v21 }
 0x3d2   :  { %1452 = vmatprep.subr.bf16.mxu0 %v1634_v24 }
 0x3d5   :  { %1454 = vmatpush3.bf16.msra.mxu0 %v1634_v24 }
 0x48b   :  { %v1125_v7 = vpop.f32.mrb[4].mxu0 }
 0x48c   :  { %v491_v9 = vadd.f32 %v1125_v7, %v792_v4  ;;  %v481_v10 = vpop.f32.mrb[5].mxu0 }
 0x48d   :  { %v490_v11 = vadd.f32 %v791_v6, %v481_v10 }
 0x48e   :  { %v493_v13 = vadd.f32 %v1673_v28, %v491_v9 }
 0x48f   :  { %v492_v14 = vadd.f32 %v1673_v28, %v490_v11 }
 0x490   :  { %1503 = vtanh.f32 %v493_v13 }
 0x491   :  { %1505 = vtanh.f32 %v492_v14 }
 0x49a   :  { %v1504_v16 = vpop.eup %1503 }
 0x49b   :  { %v1506_v17 = vpop.eup %1505  ;;  %794 = vst [vmem:[%s1863_s4 + $0x48] sm:$0xff] %v1504_v16 }
 0x49c   :  { %793 = vst [vmem:[%s1863_s4 + $0x40] sm:$0xff] %v1506_v17  ;;  %1158 = vmatprep.mubr.f32.mxu1 %v1506_v17 }
 0x49d   :  { %1159 = vmatmul.mubr.f32.vlgmr.msra.gmra.mrb[4].mxu1 %v1504_v16 }
 0x49e   :  { %1458 = vmatpush3.bf16.msra.mxu1 %v1553_v3  ;;  %v796_v3 = vld [vmem:[%s1861_s0 + $0x58] sm:$0xff] }
 0x49f   :  { %1460 = vmatprep.subr.bf16.mxu1 %v1558_v5 }
 0x4a2   :  { %1462 = vmatpush3.bf16.msra.mxu1 %v1558_v5  ;;  %v795_v5 = vld [vmem:[%s1861_s0 + $0x50] sm:$0xff] }
 0x4a3   :  { %1464 = vmatprep.subr.bf16.mxu1 %v1571_v8 }
 0x4a6   :  { %1466 = vmatpush3.bf16.msra.mxu1 %v1571_v8 }
 0x4a7   :  { %1468 = vmatprep.subr.bf16.mxu1 %v1586_v12 }
 0x4aa   :  { %1470 = vmatpush3.bf16.msra.mxu1 %v1586_v12 }
 0x4ab   :  { %1472 = vmatprep.subr.bf16.mxu1 %v1598_v15 }
 0x4ae   :  { %1474 = vmatpush3.bf16.msra.mxu1 %v1598_v15 }
 0x4af   :  { %1476 = vmatprep.subr.bf16.mxu1 %v1610_v18 }
 0x4b2   :  { %1478 = vmatpush3.bf16.msra.mxu1 %v1610_v18 }
 0x4b3   :  { %1480 = vmatprep.subr.bf16.mxu1 %v1622_v21 }
 0x4b6   :  { %1482 = vmatpush3.bf16.msra.mxu1 %v1622_v21 }
 0x4b7   :  { %1484 = vmatprep.subr.bf16.mxu1 %v1634_v24 }
 0x4ba   :  { %1486 = vmatpush3.bf16.msra.mxu1 %v1634_v24  ;;  %v799_v24 = vld [vmem:[%s1861_s0 + $0x60] sm:$0xff] }
 0x570   :  { %v1160_v8 = vpop.f32.mrb[4].mxu1 }
 0x571   :  { %v582_v12 = vadd.f32 %v1160_v8, %v796_v3  ;;  %v572_v15 = vpop.f32.mrb[5].mxu1 }
 0x572   :  { %v581_v18 = vadd.f32 %v795_v5, %v572_v15 }
 0x573   :  { %v584_v19 = vadd.f32 %v1673_v28, %v582_v12 }
 0x574   :  { %v583_v20 = vadd.f32 %v1673_v28, %v581_v18 }
 0x575   :  { %1507 = vtanh.f32 %v584_v19 }
 0x576   :  { %1509 = vtanh.f32 %v583_v20 }
 0x57f   :  { %v1508_v21 = vpop.eup %1507 }
 0x580   :  { %v1510_v22 = vpop.eup %1509  ;;  %798 = vst [vmem:[%s1863_s4 + $0x58] sm:$0xff] %v1508_v21 }
 0x581   :  { %797 = vst [vmem:[%s1863_s4 + $0x50] sm:$0xff] %v1510_v22  ;;  %1193 = vmatprep.mubr.f32.mxu0 %v1510_v22 }
 0x582   :  { %1194 = vmatmul.mubr.f32.vlgmr.msra.gmra.mrb[6].mxu0 %v1508_v21 }
 0x655   :  { %v1195_v25 = vpop.f32.mrb[6].mxu0 }
 0x656   :  { %v673_v26 = vadd.f32 %v1195_v25, %v800_v23  ;;  %v663_v27 = vpop.f32.mrb[7].mxu0 }
 0x657   :  { %v672_v29 = vadd.f32 %v799_v24, %v663_v27 }
 0x658   :  { %v675_v30 = vadd.f32 %v1673_v28, %v673_v26 }
 0x659   :  { %v674_v31 = vadd.f32 %v1673_v28, %v672_v29 }
 0x65a   :  { %1511 = vtanh.f32 %v675_v30 }
 0x65b   :  { %1513 = vtanh.f32 %v674_v31 }
 0x664   :  { %v1512_v32 = vpop.eup %1511 }
 0x665   :  { %v1514_v33 = vpop.eup %1513  ;;  %802 = vst [vmem:[%s1863_s4 + $0x68] sm:$0xff] %v1512_v32 }
 0x666   :  { %801 = vst [vmem:[%s1863_s4 + $0x60] sm:$0xff] %v1514_v33  ;;  %1228 = vmatprep.mubr.f32.mxu1 %v1514_v33 }
 0x667   :  { %1229 = vmatmul.mubr.f32.vlgmr.msra.gmra.mrb[6].mxu1 %v1512_v32 }
 0x73a   :  { %v1230_v36 = vpop.f32.mrb[6].mxu1 }
 0x73b   :  { %v764_v37 = vadd.f32 %v1230_v36, %v804_v34  ;;  %v754_v38 = vpop.f32.mrb[7].mxu1 }
 0x73c   :  { %v763_v39 = vadd.f32 %v803_v35, %v754_v38 }
 0x73d   :  { %v766_v40 = vadd.f32 %v1673_v28, %v764_v37 }
 0x73e   :  { %v765_v41 = vadd.f32 %v1673_v28, %v763_v39 }
 0x73f   :  { %1515 = vtanh.f32 %v766_v40 }
 0x740   :  { %1517 = vtanh.f32 %v765_v41 }
 0x749   :  { %v1516_v42 = vpop.eup %1515 }
 0x74a   :  { %v1518_v43 = vpop.eup %1517  ;;  %806 = vst [vmem:[%s1863_s4 + $0x78] sm:$0xff] %v1516_v42 }
 0x74b   :  { %805 = vst [vmem:[%s1863_s4 + $0x70] sm:$0xff] %v1518_v43 }

</bundles_post_ra>
